<compile_context>
chip_gen: v5e
topology: v5e:2x2
jax: 0.10.0
libtpu: 0.0.40
codegen_flags: <defaults>
</compile_context>

<pallas_src>
import math
import functools

import jax
import jax.numpy as jnp
from jax.experimental import pallas as pl
from jax.experimental.pallas import tpu as pltpu

EPS = 1e-5               # nn.LayerNorm default
BIG_NEG = -1e9           # finite "-inf": no NaN for fully-masked rows
ACT_DT = jnp.bfloat16    # inter-kernel activation / matmul-weight dtype


# ----------------------------- helpers ---------------------------------------

def _tile(dim, target, quantum, min_steps=1):
    """Largest tile <= target that divides dim and is a multiple of quantum
    (trying to yield at least `min_steps` grid steps); otherwise the full dim
    (a full-dim block always satisfies the (8,128) constraint)."""
    if min_steps > 1 and dim >= min_steps * quantum:
        target = min(target, dim // min_steps)
    if dim <= target:
        return dim
    t = (target // quantum) * quantum
    while t >= quantum:
        if dim % t == 0:
            return t
        t -= quantum
    return dim


def _compiler_params(semantics, vmem_need_bytes):
    """dimension_semantics + a generation-aware scoped-VMEM limit derived from
    the per-step block bytes (double-buffered) and clamped to chip capacity."""
    try:
        cap = int(pltpu.get_tpu_info().vmem_capacity_bytes)
    except Exception:                       # conservative fallback (v7x-sized)
        cap = 64 * 1024 * 1024
    limit = min(cap * 3 // 4, max(2 * int(vmem_need_bytes) + (8 << 20), 32 << 20))
    return pltpu.CompilerParams(dimension_semantics=semantics,
                                vmem_limit_bytes=limit)


def _pad_lanes(a, multiple=128, axis=-1):
    size = a.shape[axis]
    pad = (-size) % multiple
    if pad == 0:
        return a
    widths = [(0, 0)] * a.ndim
    widths[axis] = (0, pad)
    return jnp.pad(a, widths)


# ----------------------------- tiled linear ----------------------------------

def _matmul_kernel(x_ref, w_ref, b_ref, o_ref, acc_ref):
    @pl.when(pl.program_id(2) == 0)
    def _():
        acc_ref[...] = jnp.zeros_like(acc_ref)

    acc_ref[...] += jnp.dot(x_ref[...], w_ref[...],
                            preferred_element_type=jnp.float32)

    @pl.when(pl.program_id(2) == pl.num_programs(2) - 1)
    def _():
        o_ref[...] = (acc_ref[...] + b_ref[...]).astype(o_ref.dtype)


def linear(x, w, b, out_dtype=jnp.float32, *, tm=512, tn=512, tk=512):
    """y = x @ w + b.  x:(M,K) bf16, w:(K,N) bf16, b:(N,) f32."""
    M, K = x.shape
    N = w.shape[1]
    bm = _tile(M, tm, 16, min_steps=2)
    bn = _tile(N, tn, 128)
    bk = _tile(K, tk, 128)
    grid = (M // bm, N // bn, K // bk)
    need = (bm * bk + bk * bn) * 2 + bn * 4 \
        + bm * bn * (4 + jnp.dtype(out_dtype).itemsize)
    return pl.pallas_call(
        _matmul_kernel,
        out_shape=jax.ShapeDtypeStruct((M, N), out_dtype),
        grid=grid,
        in_specs=[pl.BlockSpec((bm, bk), lambda i, j, k: (i, k)),
                  pl.BlockSpec((bk, bn), lambda i, j, k: (k, j)),
                  pl.BlockSpec((1, bn), lambda i, j, k: (0, j))],
        out_specs=pl.BlockSpec((bm, bn), lambda i, j, k: (i, j)),
        scratch_shapes=[pltpu.VMEM((bm, bn), jnp.float32)],
        compiler_params=_compiler_params(("parallel", "parallel", "arbitrary"),
                                         need),
    )(x, w, b.reshape(1, N))


# ---------- fused FFN (w1+ReLU -> w2 + residual + LN), F tiled as reduction ---

def _ffn_kernel(x_ref, w1_ref, b1_ref, w2_ref, b2_ref, g_ref, bt_ref, o_ref,
                acc_ref):
    f = pl.program_id(1)

    @pl.when(f == 0)
    def _():
        acc_ref[...] = jnp.zeros_like(acc_ref)

    x = x_ref[...]                                              # (bm, E) bf16
    h = jnp.dot(x, w1_ref[...], preferred_element_type=jnp.float32) + b1_ref[...]
    h = jnp.maximum(h, 0.0).astype(ACT_DT)
    acc_ref[...] += jnp.dot(h, w2_ref[...], preferred_element_type=jnp.float32)

    @pl.when(f == pl.num_programs(1) - 1)
    def _():
        y = acc_ref[...] + b2_ref[...] + x_ref[...].astype(jnp.float32)  # residual
        mu = jnp.mean(y, axis=-1, keepdims=True)
        var = jnp.mean(jnp.square(y - mu), axis=-1, keepdims=True)
        o_ref[...] = ((y - mu) * jax.lax.rsqrt(var + EPS) * g_ref[...]
                      + bt_ref[...]).astype(o_ref.dtype)


def ffn_block(x2d, p, ln, *, tm=256, tf=512):
    """LayerNorm(relu(x@w1+b1)@w2 + b2 + x).  x2d:(M,E) bf16 -> (M,E) bf16."""
    M, E = x2d.shape
    F = p["w1"].shape[1]
    bm = _tile(M, tm, 16, min_steps=2)
    bf = _tile(F, tf, 128)
    need = (bm * E + E * bf + bf * E) * 2 + (bf + 3 * E) * 4 \
        + bm * bf * 6 + bm * E * 6
    return pl.pallas_call(
        _ffn_kernel,
        out_shape=jax.ShapeDtypeStruct((M, E), ACT_DT),
        grid=(M // bm, F // bf),
        in_specs=[pl.BlockSpec((bm, E), lambda i, f: (i, 0)),
                  pl.BlockSpec((E, bf), lambda i, f: (0, f)),
                  pl.BlockSpec((1, bf), lambda i, f: (0, f)),
                  pl.BlockSpec((bf, E), lambda i, f: (f, 0)),
                  pl.BlockSpec((1, E), lambda i, f: (0, 0)),
                  pl.BlockSpec((1, E), lambda i, f: (0, 0)),
                  pl.BlockSpec((1, E), lambda i, f: (0, 0))],
        out_specs=pl.BlockSpec((bm, E), lambda i, f: (i, 0)),
        scratch_shapes=[pltpu.VMEM((bm, E), jnp.float32)],
        compiler_params=_compiler_params(("parallel", "arbitrary"), need),
    )(x2d, p["w1"], p["b1"].reshape(1, F), p["w2"], p["b2"].reshape(1, E),
      ln["g"].reshape(1, E), ln["b"].reshape(1, E))


# ----------------------------- LayerNorm -------------------------------------

def _ln_kernel(x_ref, g_ref, b_ref, o_ref):
    x = x_ref[...].astype(jnp.float32)
    mu = jnp.mean(x, axis=-1, keepdims=True)
    var = jnp.mean(jnp.square(x - mu), axis=-1, keepdims=True)
    o_ref[...] = ((x - mu) * jax.lax.rsqrt(var + EPS) * g_ref[...]
                  + b_ref[...]).astype(o_ref.dtype)


def layernorm(x2d, g, b, out_dtype=ACT_DT, *, tm=512):
    M, E = x2d.shape
    bm = _tile(M, tm, 16, min_steps=2)
    need = bm * E * (2 + 4 + jnp.dtype(out_dtype).itemsize) + 2 * E * 4
    return pl.pallas_call(
        _ln_kernel,
        out_shape=jax.ShapeDtypeStruct((M, E), out_dtype),
        grid=(M // bm,),
        in_specs=[pl.BlockSpec((bm, E), lambda i: (i, 0)),
                  pl.BlockSpec((1, E), lambda i: (0, 0)),
                  pl.BlockSpec((1, E), lambda i: (0, 0))],
        out_specs=pl.BlockSpec((bm, E), lambda i: (i, 0)),
        compiler_params=_compiler_params(("parallel",), need),
    )(x2d, g.reshape(1, E), b.reshape(1, E))


# ----------------------- embedding scale + pos-enc ---------------------------

def _posenc_kernel(e_ref, p_ref, o_ref, *, scale):
    o_ref[0] = (e_ref[0] * scale + p_ref[...]).astype(o_ref.dtype)


def embed_pos(tok, pos2d, scale):
    """tok*sqrt(E) + pos (dropout = identity in eval).  (N,S,E) f32 -> bf16."""
    # TODO(synk): could be folded into the first attention layer's residual/QKV
    # read to save one small HBM round trip.
    N, S, E = tok.shape
    need = S * E * (4 + 4 + 2)
    return pl.pallas_call(
        functools.partial(_posenc_kernel, scale=scale),
        out_shape=jax.ShapeDtypeStruct((N, S, E), ACT_DT),
        grid=(N,),
        in_specs=[pl.BlockSpec((1, S, E), lambda b: (b, 0, 0)),
                  pl.BlockSpec((S, E), lambda b: (0, 0))],
        out_specs=pl.BlockSpec((1, S, E), lambda b: (b, 0, 0)),
        compiler_params=_compiler_params(("parallel",), need),
    )(tok, pos2d)


# -------- fused attention block (in-proj + all heads + out-proj + res + LN) ---

def _attn_core(q, k, v, mask, wo, bo, res, gamma, beta, o_ref, *, nhead, scale):
    """q:(L,E) f32, k/v:(S,E) f32, mask:(L,S) f32, res:(L,E) f32."""
    L, E = q.shape
    hd = E // nhead
    qb, kb, vb = q.astype(ACT_DT), k.astype(ACT_DT), v.astype(ACT_DT)
    ctx = []
    # TODO(synk): the per-head lane slices could become one head-batched
    # dot_general with a head-major (H,L,hd) relayout; kept as a static loop
    # for Mosaic-lowering robustness at small / unaligned head dims.
    for h in range(nhead):
        lo = h * hd
        s = jax.lax.dot_general(qb[:, lo:lo + hd], kb[:, lo:lo + hd],
                                (((1,), (1,)), ((), ())),
                                preferred_element_type=jnp.float32) * scale
        s = s + mask
        s = s - jnp.max(s, axis=-1, keepdims=True)
        p = jnp.exp(s)
        p = p * pl.reciprocal(jnp.sum(p, axis=-1, keepdims=True), approx=True)
        ctx.append(jnp.dot(p.astype(ACT_DT), vb[:, lo:lo + hd],
                           preferred_element_type=jnp.float32))
    # single K=E output projection over the concatenated heads (feeds MXU fully)
    ctx = jnp.concatenate(ctx, axis=-1).astype(ACT_DT)          # (L, E)
    y = jnp.dot(ctx, wo, preferred_element_type=jnp.float32) + bo + res
    mu = jnp.mean(y, axis=-1, keepdims=True)
    var = jnp.mean(jnp.square(y - mu), axis=-1, keepdims=True)
    o_ref[0] = ((y - mu) * jax.lax.rsqrt(var + EPS) * gamma
                + beta).astype(o_ref.dtype)


def _self_attn_kernel(x_ref, wqkv_ref, bqkv_ref, am_ref, pad_ref, wo_ref, bo_ref,
                      g_ref, b_ref, o_ref, *, nhead, scale, emb):
    x = x_ref[0]                                               # (L, E) bf16
    qkv = jnp.dot(x, wqkv_ref[...],
                  preferred_element_type=jnp.float32) + bqkv_ref[...]
    q, k, v = qkv[:, :emb], qkv[:, emb:2 * emb], qkv[:, 2 * emb:]
    mask = am_ref[...] + pad_ref[0]                            # (L, S) f32
    _attn_core(q, k, v, mask, wo_ref[...], bo_ref[...], x.astype(jnp.float32),
               g_ref[...], b_ref[...], o_ref, nhead=nhead, scale=scale)


def _cross_attn_kernel(y_ref, m_ref, wq_ref, bq_ref, wkv_ref, bkv_ref, am_ref,
                       pad_ref, wo_ref, bo_ref, g_ref, b_ref, o_ref,
                       *, nhead, scale, emb):
    y = y_ref[0]                                               # (T, E) bf16
    mem = m_ref[0]                                             # (S, E) bf16
    q = jnp.dot(y, wq_ref[...],
                preferred_element_type=jnp.float32) + bq_ref[...]
    kv = jnp.dot(mem, wkv_ref[...],
                 preferred_element_type=jnp.float32) + bkv_ref[...]
    k, v = kv[:, :emb], kv[:, emb:]
    mask = am_ref[...] + pad_ref[0]
    _attn_core(q, k, v, mask, wo_ref[...], bo_ref[...], y.astype(jnp.float32),
               g_ref[...], b_ref[...], o_ref, nhead=nhead, scale=scale)


def self_attention_block(x, p, ln, attn_mask, pad_add, nhead):
    """LayerNorm(MHA(x,x,x) + x).  x:(N,L,E) bf16 -> (N,L,E) bf16.
    The fused QKV projection runs inside the kernel (weights VMEM-resident)."""
    # TODO(synk): add a KV-tile grid axis with online softmax (flash-style) when
    # L*S score tiles exceed a few MiB; short sequences use this single-shot path.
    N, L, E = x.shape
    scale = 1.0 / math.sqrt(E // nhead)
    kernel = functools.partial(_self_attn_kernel, nhead=nhead, scale=scale, emb=E)
    need = (2 * L * E + E * 3 * E + E * E) * 2 + (6 * E + L) * 4 \
        + (L * 3 * E + L * L + L * E) * 4 + L * L * 4
    return pl.pallas_call(
        kernel,
        out_shape=jax.ShapeDtypeStruct((N, L, E), ACT_DT),
        grid=(N,),
        in_specs=[pl.BlockSpec((1, L, E), lambda b: (b, 0, 0)),
                  pl.BlockSpec((E, 3 * E), lambda b: (0, 0)),
                  pl.BlockSpec((1, 3 * E), lambda b: (0, 0)),
                  pl.BlockSpec((L, L), lambda b: (0, 0)),
                  pl.BlockSpec((1, 1, L), lambda b: (b, 0, 0)),
                  pl.BlockSpec((E, E), lambda b: (0, 0)),
                  pl.BlockSpec((1, E), lambda b: (0, 0)),
                  pl.BlockSpec((1, E), lambda b: (0, 0)),
                  pl.BlockSpec((1, E), lambda b: (0, 0))],
        out_specs=pl.BlockSpec((1, L, E), lambda b: (b, 0, 0)),
        compiler_params=_compiler_params(("parallel",), need),
    )(x, p["w_qkv"], p["b_qkv"].reshape(1, 3 * E), attn_mask, pad_add,
      p["wo"], p["bo"].reshape(1, E), ln["g"].reshape(1, E), ln["b"].reshape(1, E))


def cross_attention_block(y, memory, p, ln, attn_mask, pad_add, nhead):
    """LayerNorm(MHA(y, mem, mem) + y).  y:(N,T,E), memory:(N,S,E) (bf16)."""
    N, T, E = y.shape
    S = memory.shape[1]
    scale = 1.0 / math.sqrt(E // nhead)
    kernel = functools.partial(_cross_attn_kernel, nhead=nhead, scale=scale, emb=E)
    need = (2 * T * E + S * E + 4 * E * E) * 2 + (6 * E + S) * 4 \
        + (T * E + S * 2 * E + T * S + T * E) * 4 + T * S * 4
    return pl.pallas_call(
        kernel,
        out_shape=jax.ShapeDtypeStruct((N, T, E), ACT_DT),
        grid=(N,),
        in_specs=[pl.BlockSpec((1, T, E), lambda b: (b, 0, 0)),
                  pl.BlockSpec((1, S, E), lambda b: (b, 0, 0)),
                  pl.BlockSpec((E, E), lambda b: (0, 0)),
                  pl.BlockSpec((1, E), lambda b: (0, 0)),
                  pl.BlockSpec((E, 2 * E), lambda b: (0, 0)),
                  pl.BlockSpec((1, 2 * E), lambda b: (0, 0)),
                  pl.BlockSpec((T, S), lambda b: (0, 0)),
                  pl.BlockSpec((1, 1, S), lambda b: (b, 0, 0)),
                  pl.BlockSpec((E, E), lambda b: (0, 0)),
                  pl.BlockSpec((1, E), lambda b: (0, 0)),
                  pl.BlockSpec((1, E), lambda b: (0, 0)),
                  pl.BlockSpec((1, E), lambda b: (0, 0))],
        out_specs=pl.BlockSpec((1, T, E), lambda b: (b, 0, 0)),
        compiler_params=_compiler_params(("parallel",), need),
    )(y, memory, p["wq"], p["bq"].reshape(1, E),
      p["w_kv"], p["b_kv"].reshape(1, 2 * E), attn_mask, pad_add,
      p["wo"], p["bo"].reshape(1, E), ln["g"].reshape(1, E), ln["b"].reshape(1, E))


# ----------------------------- mask glue --------------------------------------

def _attn_mask_to_additive(mask, L, S):
    """Single shared (L,S) additive mask (kept in f32; clamped to finite)."""
    if mask is None:
        return jnp.zeros((L, S), jnp.float32)
    return jnp.maximum(mask.astype(jnp.float32), BIG_NEG)   # -inf -> -1e9 (NaN-safe)


def _pad_mask_to_additive(kpm, N, S):
    """(N,1,S) additive key-padding mask (f32, not replicated per head)."""
    if kpm is None:
        return jnp.zeros((N, 1, S), jnp.float32)
    return jnp.where(kpm, BIG_NEG, 0.0).astype(jnp.float32)[:, None, :]


# ----------------------------- forward pass -----------------------------------

def seq2seq_forward(params, src, tgt, src_mask, tgt_mask,
                    src_padding_mask, tgt_padding_mask, memory_key_padding_mask,
                    *, nhead):
    E = params["src_emb"].shape[1]
    S, N = src.shape
    T, _ = tgt.shape
    scale = math.sqrt(E)
    V = params["tgt_vocab"]

    # Token embedding lookup (gather) stays in plain JAX glue; internal layout is
    # batch-first (N, seq, E) bf16 so no per-layer HBM head/seq transposes.
    src_tok = jnp.take(params["src_emb"], src.T, axis=0)   # (N, S, E) f32
    tgt_tok = jnp.take(params["tgt_emb"], tgt.T, axis=0)   # (N, T, E) f32
    # TODO(synk): dropout layers are identity (eval mode).
    x = embed_pos(src_tok, params["pos"][:S], scale)       # (N, S, E) bf16
    y = embed_pos(tgt_tok, params["pos"][:T], scale)       # (N, T, E) bf16

    src_am = _attn_mask_to_additive(src_mask, S, S)
    tgt_am = _attn_mask_to_additive(tgt_mask, T, T)
    mem_am = _attn_mask_to_additive(None, T, S)
    src_pad = _pad_mask_to_additive(src_padding_mask, N, S)
    tgt_pad = _pad_mask_to_additive(tgt_padding_mask, N, T)
    mem_pad = _pad_mask_to_additive(memory_key_padding_mask, N, S)

    # encoder
    for p in params["enc_layers"]:
        x = self_attention_block(x, p["attn"], p["ln1"], src_am, src_pad, nhead)
        x = ffn_block(x.reshape(N * S, E), p, p["ln2"]).reshape(N, S, E)
    memory = layernorm(x.reshape(N * S, E),
                       params["enc_norm"]["g"],
                       params["enc_norm"]["b"]).reshape(N, S, E)

    # decoder
    for p in params["dec_layers"]:
        y = self_attention_block(y, p["self_attn"], p["ln1"], tgt_am, tgt_pad, nhead)
        y = cross_attention_block(y, memory, p["cross_attn"], p["ln2"],
                                  mem_am, mem_pad, nhead)
        y = ffn_block(y.reshape(N * T, E), p, p["ln3"]).reshape(N, T, E)
    y2 = layernorm(y.reshape(N * T, E),
                   params["dec_norm"]["g"], params["dec_norm"]["b"]).reshape(N, T, E)

    # Transpose the SMALL (N,T,E) pre-generator activations to seq-first so the
    # large (T,N,V) logits come out of the generator already in output layout.
    y2 = jnp.transpose(y2, (1, 0, 2)).reshape(T * N, E)
    logits = linear(y2, params["gen_w"], params["gen_b"])   # (T*N, Vpad) f32
    return logits.reshape(T, N, -1)[:, :, :V]


# ----------------------------- parameter setup ---------------------------------

def make_pos_embedding(maxlen, E):
    den = jnp.exp(-jnp.arange(0, E, 2, dtype=jnp.float32) * math.log(10000.0) / E)
    pos = jnp.arange(0, maxlen, dtype=jnp.float32).reshape(maxlen, 1)
    pe = jnp.zeros((maxlen, E), jnp.float32)
    pe = pe.at[:, 0::2].set(jnp.sin(pos * den))
    pe = pe.at[:, 1::2].set(jnp.cos(pos * den))
    return pe                                               # (maxlen, E) f32


def init_params(key, *, E, H, F, n_enc, n_dec, src_vocab, tgt_vocab, maxlen):
    keys = iter(jax.random.split(key, 256))

    def w(shape, scale=0.02, dtype=ACT_DT):
        return (jax.random.normal(next(keys), shape, jnp.float32) * scale).astype(dtype)

    def self_attn_params():
        return dict(w_qkv=w((E, 3 * E)), b_qkv=jnp.zeros(3 * E, jnp.float32),
                    wo=w((E, E)), bo=jnp.zeros(E, jnp.float32))

    def cross_attn_params():
        return dict(wq=w((E, E)), bq=jnp.zeros(E, jnp.float32),
                    w_kv=w((E, 2 * E)), b_kv=jnp.zeros(2 * E, jnp.float32),
                    wo=w((E, E)), bo=jnp.zeros(E, jnp.float32))

    def ln():
        return dict(g=jnp.ones(E, jnp.float32), b=jnp.zeros(E, jnp.float32))

    enc_layers = [dict(attn=self_attn_params(), ln1=ln(), ln2=ln(),
                       w1=w((E, F)), b1=jnp.zeros(F, jnp.float32),
                       w2=w((F, E)), b2=jnp.zeros(E, jnp.float32))
                  for _ in range(n_enc)]
    dec_layers = [dict(self_attn=self_attn_params(), cross_attn=cross_attn_params(),
                       ln1=ln(), ln2=ln(), ln3=ln(),
                       w1=w((E, F)), b1=jnp.zeros(F, jnp.float32),
                       w2=w((F, E)), b2=jnp.zeros(E, jnp.float32))
                  for _ in range(n_dec)]
    # Generator weights padded to a lane-dense vocab (multiple of 128) so the
    # big logits matmul emits unmasked full-width stores; sliced back in glue.
    gen_w = _pad_lanes(w((E, tgt_vocab)), 128, axis=1)
    gen_b = _pad_lanes(jnp.zeros(tgt_vocab, jnp.float32), 128, axis=0)
    return dict(
        src_emb=w((src_vocab, E), scale=1.0, dtype=jnp.float32),
        tgt_emb=w((tgt_vocab, E), scale=1.0, dtype=jnp.float32),
        pos=make_pos_embedding(maxlen, E),
        enc_layers=enc_layers, dec_layers=dec_layers,
        enc_norm=ln(), dec_norm=ln(),
        gen_w=gen_w, gen_b=gen_b, tgt_vocab=tgt_vocab,
    )


# ----------------------------------- main ---------------------------------------

if __name__ == "__main__":
    key = jax.random.PRNGKey(0)
    E, H, F = 32, 4, 64
    n_enc = n_dec = 2
    src_vocab, tgt_vocab = 50, 60
    S, T, N = 10, 8, 2

    pkey, skey, tkey = jax.random.split(key, 3)
    params = init_params(pkey, E=E, H=H, F=F, n_enc=n_enc, n_dec=n_dec,
                         src_vocab=src_vocab, tgt_vocab=tgt_vocab, maxlen=64)

    src = jax.random.randint(skey, (S, N), 0, src_vocab, dtype=jnp.int32)
    tgt = jax.random.randint(tkey, (T, N), 0, tgt_vocab, dtype=jnp.int32)

    src_mask = jnp.zeros((S, S), jnp.float32)
    tgt_mask = jnp.where(jnp.triu(jnp.ones((T, T), bool), k=1),
                         -jnp.inf, 0.0).astype(jnp.float32)       # causal
    src_padding_mask = jnp.zeros((N, S), bool).at[1, S - 1].set(True)
    tgt_padding_mask = jnp.zeros((N, T), bool).at[1, T - 1].set(True)
    memory_key_padding_mask = src_padding_mask

    out = seq2seq_forward(params, src, tgt, src_mask, tgt_mask,
                          src_padding_mask, tgt_padding_mask,
                          memory_key_padding_mask, nhead=H)
    jax.block_until_ready(out)
    assert out.shape == (T, N, tgt_vocab)
    assert bool(jnp.all(jnp.isfinite(out)))
    print("KERNEL_OK")
</pallas_src>

<mosaic_0001>
module attributes {stable_mosaic.version = 11 : i64} {
  func.func @_posenc_kernel(%arg0: i32, %arg1: memref<1x10x32xf32, #tpu.memory_space<vmem>>, %arg2: memref<10x32xf32, #tpu.memory_space<vmem>>, %arg3: memref<1x10x32xbf16, #tpu.memory_space<vmem>>) attributes {dimension_semantics = [#tpu.dimension_semantics<parallel>], iteration_bounds = array<i64: 2>, scalar_prefetch = 0 : i64, scratch_operands = 0 : i64, tpu.core_type = #tpu.core_type<tc>, window_params = [{transform_indices = @transform_0, window_bounds = array<i64: 1, 10, 32>}, {pipeline_mode = #tpu.pipeline_mode<synchronous>, transform_indices = @transform_1, window_bounds = array<i64: 10, 32>}, {transform_indices = @transform_2, window_bounds = array<i64: 1, 10, 32>}]} {
    %c0 = arith.constant 0 : index
    %c0_0 = arith.constant 0 : index
    %c0_1 = arith.constant 0 : index
    %0 = vector.load %arg1[%c0, %c0_0, %c0_1] : memref<1x10x32xf32, #tpu.memory_space<vmem>>, vector<1x10x32xf32>
    %1 = vector.shape_cast %0 : vector<1x10x32xf32> to vector<10x32xf32>
    %cst = arith.constant 5.65685415 : f32
    %2 = vector.broadcast %cst : f32 to vector<10x32xf32>
    %3 = arith.mulf %1, %2 : vector<10x32xf32>
    %c0_2 = arith.constant 0 : index
    %c0_3 = arith.constant 0 : index
    %4 = vector.load %arg2[%c0_2, %c0_3] : memref<10x32xf32, #tpu.memory_space<vmem>>, vector<10x32xf32>
    %5 = arith.addf %3, %4 : vector<10x32xf32>
    %6 = arith.truncf %5 : vector<10x32xf32> to vector<10x32xbf16>
    %c0_4 = arith.constant 0 : index
    %c0_5 = arith.constant 0 : index
    %c0_6 = arith.constant 0 : index
    %7 = vector.load %arg3[%c0_4, %c0_5, %c0_6] : memref<1x10x32xbf16, #tpu.memory_space<vmem>>, vector<1x10x32xbf16>
    %8 = vector.shape_cast %7 : vector<1x10x32xbf16> to vector<10x32xbf16>
    %9 = vector.shape_cast %6 : vector<10x32xbf16> to vector<1x10x32xbf16>
    tpu.vector_store %arg3[%c0_4, %c0_5, %c0_6], %9 {strides = array<i32>} : memref<1x10x32xbf16, #tpu.memory_space<vmem>>, vector<1x10x32xbf16>,
    return
  }
  func.func @transform_0(%arg0: i32) -> (i32, i32, i32) {
    %c0_i32 = arith.constant 0 : i32
    %c0_i32_0 = arith.constant 0 : i32
    %c0_i32_1 = arith.constant 0 : i32
    return %arg0, %c0_i32, %c0_i32_0 : i32, i32, i32
  }
  func.func @transform_1(%arg0: i32) -> (i32, i32) {
    %c0_i32 = arith.constant 0 : i32
    %c0_i32_0 = arith.constant 0 : i32
    %c0_i32_1 = arith.constant 0 : i32
    return %c0_i32, %c0_i32_0 : i32, i32
  }
  func.func @transform_2(%arg0: i32) -> (i32, i32, i32) {
    %c0_i32 = arith.constant 0 : i32
    %c0_i32_0 = arith.constant 0 : i32
    %c0_i32_1 = arith.constant 0 : i32
    return %arg0, %c0_i32, %c0_i32_0 : i32, i32, i32
  }
}

</mosaic_0001>

<bundles_post_ra>
// kernel: tpu_custom_call.1
= control target key start
LH: loop header
LB: loop body
LE: loop exit
PB: predicated region body
PF: predicated region fallthrough
CT: control target
= control target key end

     0   :  { %s257_s9 = smov 0   ;;  %s280_s0 = inlined_call_operand.vmem [shape: f32[2,10,32], index: 0, kind: input, shape index: {}]   ;;  %s281_s1 = inlined_call_operand.vmem [shape: f32[10,32], index: 1, kind: input, shape index: {}]   ;;  %s282_s2 = inlined_call_operand.vmem [shape: bf16[2,10,32], index: 2, kind: output, shape index: {}]  }
   0x1 LB: > { %s213_s10 = sadd.s32 4294967295, %s240_s9   ;;  %p217_p0 = scmp.ge.s32.totalorder %s240_s9, 1  ;;  %s240_s9 = sphi %s257_s9, %s12_s9  }
   0x2   : > { %p112_p1 = scmp.lt.s32.totalorder %s240_s9, 3 }
   0x4   : > { %p113_p2 = pnand %p217_p0, %p112_p1 }
   0x5   : > { %p134_p3 = scmp.lt.s32.totalorder (!%p113_p2), %s213_s10, 1 }
   0x6   : > { %116 = sbr.rel (%p113_p2) target bundleno = 23 (0x17), region = 28 }
   0xb   : > { %s284_s10 = smov (!%p134_p3, %s213_s10), 1  ;;  %v148_v0 = vld [vmem:[%s281_s1] sm:$0xff]  ;;  %v149_v3 = vld [vmem:[%s281_s1 + $0x8] sm:$0x3]  ;;  %vm154_vm0 = vcmask 257024   ;;  %vm156_vm1 = vcmask 253952  }
   0xc   : > { %s224_s11 = sshll.u32 %s284_s10, 4  ;;  %s225_s19 = sshll.u32 %s284_s10, 3 }
   0xd   : > { %s138_s14 = scalar_lea.vmem %s280_s0, %s224_s11  ;;  %s143_s22 = scalar_lea.vmem %s282_s2, %s225_s19 }
   0xe   : > { %v144_v1 = vld [vmem:[%s138_s14] sm:$0xff]  ;;  %v145_v2 = vld [vmem:[%s138_s14 + $0x8] sm:$0x3] }
   0xf   : > { %v146_v4 = vmul.f32 5.656854, %v144_v1  ;;  %v147_v5 = vmul.f32 5.656854, %v145_v2 }
  0x11   : > { %v150_v6 = vadd.f32 %v148_v0, %v146_v4  ;;  %v151_v7 = vadd.f32 %v149_v3, %v147_v5 }
  0x13   : > { %v152_v8 = vpack.c.bf16 %v150_v6, %v150_v6  ;;  %v153_v9 = vpack.c.bf16 %v151_v7, %v151_v7 }
  0x15   : > { %155 = vst.msk [vmem:[%s143_s22] sm:$0xf] %vm154_vm0, %v152_v8 }
  0x16   : > { %157 = vst.msk [vmem:[%s143_s22 + $0x4] sm:$0x1] %vm156_vm1, %v153_v9 }
  0x17 PF: > { %s12_s9 = sadd.s32 1, %s240_s9  }
  0x18   : > { %p9_p4 = scmp.ge.s32.totalorder %s12_s9, 4  }
  0x1a   :  { %11 = sbr.rel (!%p9_p4) target bundleno = 1 (0x1), region = 58 }

</bundles_post_ra>
